<compile_context>
chip_gen: v5e
topology: v5e:2x2
jax: 0.10.0
libtpu: 0.0.40
codegen_flags: <defaults>
</compile_context>

<pallas_src>
import numpy as np
import jax
import jax.numpy as jnp
from jax.experimental import pallas as pl
from jax.experimental.pallas import tpu as pltpu

# ----------------------------- model dims -----------------------------------
B, CIN, H, W = 2, 4, 16, 16      # batch of semantic masks (NCHW in the API)
CF = 32                          # backbone feature channels
D = 64                           # descriptor dimension
D_PAD = 128                      # lane-dense kernel output width (sliced to D)
M_PAD = 8                        # sublane-dense pooled/output rows (sliced to B)
GEM_P = 3.0
GEM_EPS = 1e-6
K_IM2COL = 9 * CIN               # 36
HW = H * W                       # 256


# ----------------------------- Pallas kernel ---------------------------------
def fused_semantic_kernel(p_ref, wc_ref, bc_ref, avg_ref, wh_ref, bh_ref, o_ref):
    """Conv3x3(+bias+ReLU) -> GeM(p=3) -> Linear, fully fused.

    p_ref  : (B*H*W, 9*CIN)  im2col patches
    wc_ref : (9*CIN, CF)     conv weight, HWIO flattened to match patch order
    bc_ref : (1, CF)         conv bias
    avg_ref: (M_PAD, B*H*W)  block-diag per-batch averaging matrix (rows >= B are zero)
    wh_ref : (CF, D_PAD)     head weight, zero-padded to 128 lanes
    bh_ref : (1, D_PAD)      head bias, zero-padded to 128 lanes
    o_ref  : (M_PAD, D_PAD)  descriptor (first B rows / D columns valid)
    """
    # Conv as one MXU matmul: (512, 36) @ (36, 32) -> (512, 32), + bias + ReLU.
    feat = jnp.dot(p_ref[...], wc_ref[...], preferred_element_type=jnp.float32)
    feat = jnp.maximum(feat + bc_ref[...], 0.0)

    # GeM p=3: clamp + cube on the VPU (no transcendental over the 16K features),
    # per-batch spatial mean via a tiny matmul (MXU reduction, no reshape/XLU).
    f = jnp.maximum(feat, GEM_EPS)
    pooled = jnp.dot(avg_ref[...], f * f * f,
                     preferred_element_type=jnp.float32)          # (M_PAD, CF)
    # Real rows are >= eps^p by construction, so this clamp only keeps the
    # zero-padded rows finite through the cube root; it never changes results.
    pooled = jnp.maximum(pooled, GEM_EPS ** GEM_P)
    pooled = pooled ** (1.0 / GEM_P)                              # M_PAD*CF elems only

    # Head linear projection, lane-dense output: (8, CF) @ (CF, 128) + (1, 128).
    o_ref[...] = (jnp.dot(pooled, wh_ref[...],
                          preferred_element_type=jnp.float32) + bh_ref[...])


# ----------------------------- wrappers ---------------------------------------
def _im2col(x_nchw):
    """NCHW -> (B*H*W, 9*CIN) patches for a 3x3 'same' conv (XLA layout glue)."""
    x = jnp.transpose(x_nchw, (0, 2, 3, 1))                       # NHWC
    x_pad = jnp.pad(x, ((0, 0), (1, 1), (1, 1), (0, 0)))          # 'same' padding
    patches = jnp.concatenate(
        [x_pad[:, dy:dy + H, dx:dx + W, :] for dy in range(3) for dx in range(3)],
        axis=-1)                                                  # (B, H, W, 9*CIN)
    return patches.reshape(B * H * W, K_IM2COL)


def prepare_params(params):
    """Hoist all data-independent constant prep out of the forward path (done once)."""
    wc = params["w_conv"].reshape(K_IM2COL, CF).astype(jnp.float32)   # (dy,dx,cin) flat
    bc = params["b_conv"].reshape(1, CF).astype(jnp.float32)
    # Block-diagonal averaging matrix, padded to 8 rows (rows B..7 are zero).
    avg_np = np.zeros((M_PAD, B * HW), np.float32)
    for b in range(B):
        avg_np[b, b * HW:(b + 1) * HW] = 1.0 / float(HW)
    avg = jnp.asarray(avg_np)
    # Zero-pad head weight/bias to a 128-lane output (unmasked vector stores).
    wh = jnp.zeros((CF, D_PAD), jnp.float32).at[:, :D].set(params["w_head"])
    bh = jnp.zeros((1, D_PAD), jnp.float32).at[0, :D].set(params["b_head"])
    return {"wc": wc, "bc": bc, "avg": avg, "wh": wh, "bh": bh}


_COST = pl.CostEstimate(
    flops=2 * (B * HW * K_IM2COL * CF      # conv matmul
               + M_PAD * B * HW * CF       # averaging matmul
               + M_PAD * CF * D_PAD)       # head matmul
          + 4 * B * HW * CF,               # bias/relu/cube VPU work
    transcendentals=2 * M_PAD * CF,        # pow(1/3) = exp/log on pooled only
    bytes_accessed=4 * (B * HW * K_IM2COL + K_IM2COL * CF + CF
                        + M_PAD * B * HW + CF * D_PAD + D_PAD + M_PAD * D_PAD),
)


@jax.jit
def _semantic_backbone_head(x_nchw, prep):
    """backbone (conv+ReLU) + head (GeM + Linear) in one fused pallas_call, jitted."""
    patches = _im2col(x_nchw)
    desc_pad = pl.pallas_call(
        fused_semantic_kernel,
        out_shape=jax.ShapeDtypeStruct((M_PAD, D_PAD), jnp.float32),
        in_specs=[pl.BlockSpec(memory_space=pltpu.MemorySpace.VMEM)
                  for _ in range(6)],
        out_specs=pl.BlockSpec(memory_space=pltpu.MemorySpace.VMEM),
        cost_estimate=_COST,
    )(patches, prep["wc"], prep["bc"], prep["avg"], prep["wh"], prep["bh"])
    return desc_pad[:B, :D]                                       # (B, D)


def semantic_model_forward(batch, prep):
    """JAX equivalent of SemanticModel.forward (fp32 path, fusion=None)."""
    mask_descriptors = {}
    for key, value in batch.items():
        if key.startswith("masks_"):
            mask_descriptors[key] = _semantic_backbone_head(value, prep)
    if len(mask_descriptors) > 1:
        # TODO(synk): fusion module not defined for this synthetic instantiation.
        raise ValueError("Fusion module is not defined but multiple masks are provided")
    descriptor = list(mask_descriptors.values())[0]
    return {"final_descriptor": descriptor}


# ----------------------------- reference (pure JAX) ---------------------------
def reference_forward(batch, params):
    value = batch["masks_front"]
    x = jnp.transpose(value, (0, 2, 3, 1))
    feat = jax.lax.conv_general_dilated(
        x, params["w_conv"], window_strides=(1, 1), padding="SAME",
        dimension_numbers=("NHWC", "HWIO", "NHWC"))
    feat = jnp.maximum(feat + params["b_conv"], 0.0)
    f = jnp.maximum(feat, GEM_EPS)
    pooled = jnp.mean(f ** GEM_P, axis=(1, 2)) ** (1.0 / GEM_P)
    return pooled @ params["w_head"] + params["b_head"]


# ----------------------------- main -------------------------------------------
if __name__ == "__main__":
    key = jax.random.PRNGKey(0)
    k_x, k_wc, k_bc, k_wh, k_bh = jax.random.split(key, 5)

    # Semantic mask input, NCHW as the PyTorch module expects.
    x = jax.random.normal(k_x, (B, CIN, H, W), jnp.float32)

    params = {
        "w_conv": 0.1 * jax.random.normal(k_wc, (3, 3, CIN, CF), jnp.float32),
        "b_conv": 0.1 * jax.random.normal(k_bc, (CF,), jnp.float32),
        "w_head": 0.1 * jax.random.normal(k_wh, (CF, D), jnp.float32),
        "b_head": 0.1 * jax.random.normal(k_bh, (D,), jnp.float32),
    }
    prep = prepare_params(params)          # constants built once, outside the hot path

    batch = {"masks_front": x}
    out = semantic_model_forward(batch, prep)
    desc = jax.block_until_ready(out["final_descriptor"])
    assert desc.shape == (B, D) and desc.dtype == jnp.float32

    ref = jax.block_until_ready(reference_forward(batch, params))
    assert jnp.allclose(desc, ref, atol=1e-4, rtol=1e-4), "mismatch vs reference"

    print("KERNEL_OK")
</pallas_src>

<mosaic_0001>
module attributes {stable_mosaic.version = 11 : i64} {
  func.func @fused_semantic_kernel(%arg0: memref<512x36xf32, #tpu.memory_space<vmem>>, %arg1: memref<36x32xf32, #tpu.memory_space<vmem>>, %arg2: memref<1x32xf32, #tpu.memory_space<vmem>>, %arg3: memref<8x512xf32, #tpu.memory_space<vmem>>, %arg4: memref<32x128xf32, #tpu.memory_space<vmem>>, %arg5: memref<1x128xf32, #tpu.memory_space<vmem>>, %arg6: memref<8x128xf32, #tpu.memory_space<vmem>>) attributes {dimension_semantics = [], scalar_prefetch = 0 : i64, scratch_operands = 0 : i64, tpu.core_type = #tpu.core_type<tc>} {
    %c0 = arith.constant 0 : index
    %c0_0 = arith.constant 0 : index
    %0 = vector.load %arg0[%c0, %c0_0] : memref<512x36xf32, #tpu.memory_space<vmem>>, vector<512x36xf32>
    %c0_1 = arith.constant 0 : index
    %c0_2 = arith.constant 0 : index
    %1 = vector.load %arg1[%c0_1, %c0_2] : memref<36x32xf32, #tpu.memory_space<vmem>>, vector<36x32xf32>
    %cst = arith.constant dense<0.000000e+00> : vector<512x32xf32>
    %2 = tpu.matmul %0, %1, %cst {dimension_numbers = #tpu.dot_dimension_numbers<[1], [0], [0], [1], [0, 0, 1, 1], [], []>} : vector<512x36xf32>, vector<36x32xf32>, vector<512x32xf32> -> vector<512x32xf32>
    %c0_3 = arith.constant 0 : index
    %c0_4 = arith.constant 0 : index
    %3 = vector.load %arg2[%c0_3, %c0_4] : memref<1x32xf32, #tpu.memory_space<vmem>>, vector<1x32xf32>
    %4 = vector.broadcast %3 : vector<1x32xf32> to vector<512x32xf32>
    %5 = arith.addf %2, %4 : vector<512x32xf32>
    %cst_5 = arith.constant 0.000000e+00 : f32
    %6 = vector.broadcast %cst_5 : f32 to vector<512x32xf32>
    %7 = arith.maximumf %5, %6 : vector<512x32xf32>
    %cst_6 = arith.constant 9.99999997E-7 : f32
    %8 = vector.broadcast %cst_6 : f32 to vector<512x32xf32>
    %9 = arith.maximumf %7, %8 : vector<512x32xf32>
    %c0_7 = arith.constant 0 : index
    %c0_8 = arith.constant 0 : index
    %10 = vector.load %arg3[%c0_7, %c0_8] : memref<8x512xf32, #tpu.memory_space<vmem>>, vector<8x512xf32>
    %11 = arith.mulf %9, %9 : vector<512x32xf32>
    %12 = arith.mulf %11, %9 : vector<512x32xf32>
    %cst_9 = arith.constant dense<0.000000e+00> : vector<8x32xf32>
    %13 = tpu.matmul %10, %12, %cst_9 {dimension_numbers = #tpu.dot_dimension_numbers<[1], [0], [0], [1], [0, 0, 1, 1], [], []>} : vector<8x512xf32>, vector<512x32xf32>, vector<8x32xf32> -> vector<8x32xf32>
    %cst_10 = arith.constant 1.000000e-18 : f32
    %14 = vector.broadcast %cst_10 : f32 to vector<8x32xf32>
    %15 = arith.maximumf %13, %14 : vector<8x32xf32>
    %cst_11 = arith.constant 0.333333343 : f32
    %16 = vector.broadcast %cst_11 : f32 to vector<8x32xf32>
    %17 = math.powf %15, %16 : vector<8x32xf32>
    %c0_12 = arith.constant 0 : index
    %c0_13 = arith.constant 0 : index
    %18 = vector.load %arg4[%c0_12, %c0_13] : memref<32x128xf32, #tpu.memory_space<vmem>>, vector<32x128xf32>
    %cst_14 = arith.constant dense<0.000000e+00> : vector<8x128xf32>
    %19 = tpu.matmul %17, %18, %cst_14 {dimension_numbers = #tpu.dot_dimension_numbers<[1], [0], [0], [1], [0, 0, 1, 1], [], []>} : vector<8x32xf32>, vector<32x128xf32>, vector<8x128xf32> -> vector<8x128xf32>
    %c0_15 = arith.constant 0 : index
    %c0_16 = arith.constant 0 : index
    %20 = vector.load %arg5[%c0_15, %c0_16] : memref<1x128xf32, #tpu.memory_space<vmem>>, vector<1x128xf32>
    %21 = vector.broadcast %20 : vector<1x128xf32> to vector<8x128xf32>
    %22 = arith.addf %19, %21 : vector<8x128xf32>
    %c0_17 = arith.constant 0 : index
    %c0_18 = arith.constant 0 : index
    %23 = vector.load %arg6[%c0_17, %c0_18] : memref<8x128xf32, #tpu.memory_space<vmem>>, vector<8x128xf32>
    tpu.vector_store %arg6[%c0_17, %c0_18], %22 {strides = array<i32>} : memref<8x128xf32, #tpu.memory_space<vmem>>, vector<8x128xf32>,
    return
  }
}

</mosaic_0001>

<bundles_post_ra>
// kernel: _semantic_backbone_head.1
= control target key start
LH: loop header
LB: loop body
LE: loop exit
PB: predicated region body
PF: predicated region fallthrough
CT: control target
= control target key end

     0   :  { %vm289_vm0 = vcmask 1043456   ;;  %vm96_vm1 = vcmask 293888   ;;  %vm852_vm6 = vcmask 261120   ;;  %s1558_s1 = inlined_call_operand.vmem [shape: f32[36,32], index: 1, kind: input, shape index: {}]   ;;  %s1559_s0 = inlined_call_operand.vmem [shape: f32[512,36], index: 0, kind: input, shape index: {}]   ;;  %s1560_s2 = inlined_call_operand.vmem [shape: f32[1,32], index: 2, kind: input, shape index: {}]   ;;  %s1561_s3 = inlined_call_operand.vmem [shape: f32[8,512], index: 3, kind: input, shape index: {}]   ;;  %s1562_s5 = inlined_call_operand.vmem [shape: f32[1,128], index: 5, kind: input, shape index: {}]   ;;  %s1563_s4 = inlined_call_operand.vmem [shape: f32[32,128], index: 4, kind: input, shape index: {}]   ;;  %s1564_s6 = inlined_call_operand.vmem [shape: f32[8,128], index: 6, kind: output, shape index: {}]  }
   0x1   :  { %v91_v0 = vld [vmem:[%s1558_s1 + $0x20] sm:$0xf]  ;;  %v90_v1 = vld [vmem:[%s1558_s1 + $0x18] sm:$0xff]  ;;  %v89_v2 = vld [vmem:[%s1558_s1 + $0x10] sm:$0xff] }
   0x2   :  { %881 = vmatpush.msk.msra.mxu0 %vm289_vm0, %v91_v0  ;;  %947 = vmatpush.msk.msra.mxu1 %vm289_vm0, %v91_v0  ;;  %v88_v3 = vld [vmem:[%s1558_s1 + $0x8] sm:$0xff]  ;;  %v87_v4 = vld [vmem:[%s1558_s1] sm:$0xff]  ;;  %v53_v7 = vld [vmem:[%s1559_s0 + $0xf0] sm:$0xff] }
   0x3   :  { %948 = vmatpush.msk.msra.mxu2 %vm289_vm0, %v91_v0  ;;  %949 = vmatpush.msk.msra.mxu3 %vm289_vm0, %v91_v0  ;;  %v23_v5 = vld [vmem:[%s1559_s0] sm:$0xff]  ;;  %v69_v8 = vld [vmem:[%s1559_s0 + $0x170] sm:$0xff]  ;;  %v24_v9 = vld [vmem:[%s1559_s0 + $0x8] sm:$0xff] }
   0x4   :  { %305 = vmatpush.msra.mxu0 %v90_v1  ;;  %950 = vmatpush.msra.mxu1 %v90_v1  ;;  %v43_v6 = vld [vmem:[%s1559_s0 + $0xa0] sm:$0xff]  ;;  %v44_v10 = vld [vmem:[%s1559_s0 + $0xa8] sm:$0xff]  ;;  %v54_v11 = vld [vmem:[%s1559_s0 + $0xf8] sm:$0xff] }
   0x5   :  { %951 = vmatpush.msra.mxu2 %v90_v1  ;;  %952 = vmatpush.msra.mxu3 %v90_v1  ;;  %v70_v12 = vld [vmem:[%s1559_s0 + $0x178] sm:$0xff]  ;;  %v25_v13 = vld [vmem:[%s1559_s0 + $0x10] sm:$0xff]  ;;  %v55_v15 = vld [vmem:[%s1559_s0 + $0x100] sm:$0xff] }
   0x6   :  { %306 = vmatpush.msra.mxu0 %v89_v2  ;;  %953 = vmatpush.msra.mxu1 %v89_v2  ;;  %v45_v14 = vld [vmem:[%s1559_s0 + $0xb0] sm:$0xff]  ;;  %v71_v16 = vld [vmem:[%s1559_s0 + $0x180] sm:$0xff]  ;;  %v26_v17 = vld [vmem:[%s1559_s0 + $0x18] sm:$0xff] }
   0x7   :  { %954 = vmatpush.msra.mxu2 %v89_v2  ;;  %955 = vmatpush.msra.mxu3 %v89_v2  ;;  %v46_v18 = vld [vmem:[%s1559_s0 + $0xb8] sm:$0xff]  ;;  %v56_v19 = vld [vmem:[%s1559_s0 + $0x108] sm:$0xff]  ;;  %v27_v21 = vld [vmem:[%s1559_s0 + $0x20] sm:$0xff] }
   0x8   :  { %307 = vmatpush.msra.mxu0 %v88_v3  ;;  %956 = vmatpush.msra.mxu1 %v88_v3  ;;  %v72_v20 = vld [vmem:[%s1559_s0 + $0x188] sm:$0xff]  ;;  %v47_v22 = vld [vmem:[%s1559_s0 + $0xc0] sm:$0xff]  ;;  %v57_v23 = vld [vmem:[%s1559_s0 + $0x110] sm:$0xff] }
   0x9   :  { %957 = vmatpush.msra.mxu2 %v88_v3  ;;  %958 = vmatpush.msra.mxu3 %v88_v3  ;;  %v73_v24 = vld [vmem:[%s1559_s0 + $0x190] sm:$0xff]  ;;  %v28_v25 = vld [vmem:[%s1559_s0 + $0x28] sm:$0xff]  ;;  %v58_v27 = vld [vmem:[%s1559_s0 + $0x118] sm:$0xff] }
   0xa   :  { %308 = vmatpush.msra.mxu0 %v87_v4  ;;  %959 = vmatpush.msra.mxu1 %v87_v4  ;;  %v48_v26 = vld [vmem:[%s1559_s0 + $0xc8] sm:$0xff]  ;;  %v74_v28 = vld [vmem:[%s1559_s0 + $0x198] sm:$0xff]  ;;  %v29_v29 = vld [vmem:[%s1559_s0 + $0x30] sm:$0xff] }
   0xb   :  { %960 = vmatpush.msra.mxu2 %v87_v4  ;;  %882 = vmatmul.msk.f32.vlgmr.msra.gmra.mxu0 %vm96_vm1, %v23_v5  ;;  %v49_v30 = vld [vmem:[%s1559_s0 + $0xd0] sm:$0xff]  ;;  %v59_v31 = vld [vmem:[%s1559_s0 + $0x120] sm:$0xff]  ;;  %v30_v33 = vld [vmem:[%s1559_s0 + $0x38] sm:$0xff] }
   0xc   :  { %902 = vmatmul.msk.f32.vlgmr.msra.gmra.mxu1 %vm96_vm1, %v43_v6  ;;  %912 = vmatmul.msk.f32.vlgmr.msra.gmra.mxu2 %vm96_vm1, %v53_v7  ;;  %v75_v32 = vld [vmem:[%s1559_s0 + $0x1a0] sm:$0xff]  ;;  %v50_v34 = vld [vmem:[%s1559_s0 + $0xd8] sm:$0xff]  ;;  %v60_v35 = vld [vmem:[%s1559_s0 + $0x128] sm:$0xff] }
   0xd   :  { %961 = vmatpush.msra.mxu3 %v87_v4  ;;  %v76_v36 = vld [vmem:[%s1559_s0 + $0x1a8] sm:$0xff]  ;;  %v31_v37 = vld [vmem:[%s1559_s0 + $0x40] sm:$0xff]  ;;  %v61_v39 = vld [vmem:[%s1559_s0 + $0x130] sm:$0xff] }
   0xe   :  { %928 = vmatmul.msk.f32.vlgmr.msra.gmra.mxu3 %vm96_vm1, %v69_v8  ;;  %v51_v38 = vld [vmem:[%s1559_s0 + $0xe0] sm:$0xff]  ;;  %v77_v40 = vld [vmem:[%s1559_s0 + $0x1b0] sm:$0xff]  ;;  %v32_v41 = vld [vmem:[%s1559_s0 + $0x48] sm:$0xff] }
   0xf   :  { %v52_v42 = vld [vmem:[%s1559_s0 + $0xe8] sm:$0xff]  ;;  %v62_v43 = vld [vmem:[%s1559_s0 + $0x138] sm:$0xff]  ;;  %v33_v45 = vld [vmem:[%s1559_s0 + $0x50] sm:$0xff] }
  0x10   :  { %v78_v44 = vld [vmem:[%s1559_s0 + $0x1b8] sm:$0xff]  ;;  %v63_v46 = vld [vmem:[%s1559_s0 + $0x140] sm:$0xff]  ;;  %v64_v49 = vld [vmem:[%s1559_s0 + $0x148] sm:$0xff] }
  0x11   :  { %v79_v47 = vld [vmem:[%s1559_s0 + $0x1c0] sm:$0xff]  ;;  %v34_v48 = vld [vmem:[%s1559_s0 + $0x58] sm:$0xff]  ;;  %v80_v50 = vld [vmem:[%s1559_s0 + $0x1c8] sm:$0xff] }
  0x12   :  { %v35_v51 = vld [vmem:[%s1559_s0 + $0x60] sm:$0xff]  ;;  %v65_v52 = vld [vmem:[%s1559_s0 + $0x150] sm:$0xff]  ;;  %v36_v54 = vld [vmem:[%s1559_s0 + $0x68] sm:$0xff] }
  0x13   :  { %883 = vmatmul.msk.f32.gmra.mxu0 %vm96_vm1, %v24_v9  ;;  %v81_v53 = vld [vmem:[%s1559_s0 + $0x1d0] sm:$0xff]  ;;  %v66_v55 = vld [vmem:[%s1559_s0 + $0x158] sm:$0xff]  ;;  %v67_v58 = vld [vmem:[%s1559_s0 + $0x160] sm:$0xff] }
  0x14   :  { %903 = vmatmul.msk.f32.gmra.mxu1 %vm96_vm1, %v44_v10  ;;  %913 = vmatmul.msk.f32.gmra.mxu2 %vm96_vm1, %v54_v11  ;;  %v82_v56 = vld [vmem:[%s1559_s0 + $0x1d8] sm:$0xff]  ;;  %v37_v57 = vld [vmem:[%s1559_s0 + $0x70] sm:$0xff]  ;;  %v83_v59 = vld [vmem:[%s1559_s0 + $0x1e0] sm:$0xff] }
  0x15   :  { %v38_v60 = vld [vmem:[%s1559_s0 + $0x78] sm:$0xff]  ;;  %v68_v61 = vld [vmem:[%s1559_s0 + $0x168] sm:$0xff]  ;;  %v39_v0 = vld [vmem:[%s1559_s0 + $0x80] sm:$0xff] }
  0x16   :  { %929 = vmatmul.msk.f32.gmra.mxu3 %vm96_vm1, %v70_v12  ;;  %v84_v62 = vld [vmem:[%s1559_s0 + $0x1e8] sm:$0xff]  ;;  %v85_v2 = vld [vmem:[%s1559_s0 + $0x1f0] sm:$0xff]  ;;  %v1288_v3 = vld [vmem:[%s1560_s2] ss:$0 sm:$0xff] }
  0x17   :  { %v40_v7 = vld [vmem:[%s1559_s0 + $0x88] sm:$0xff]  ;;  %v86_v10 = vld [vmem:[%s1559_s0 + $0x1f8] sm:$0xff] }
  0x1b   :  { %884 = vmatmul.msk.f32.gmra.mxu0 %vm96_vm1, %v25_v13 }
  0x1c   :  { %904 = vmatmul.msk.f32.gmra.mxu1 %vm96_vm1, %v45_v14  ;;  %914 = vmatmul.msk.f32.gmra.mxu2 %vm96_vm1, %v55_v15 }
  0x1e   :  { %930 = vmatmul.msk.f32.gmra.mxu3 %vm96_vm1, %v71_v16 }
  0x23   :  { %885 = vmatmul.msk.f32.gmra.mxu0 %vm96_vm1, %v26_v17 }
  0x24   :  { %905 = vmatmul.msk.f32.gmra.mxu1 %vm96_vm1, %v46_v18  ;;  %915 = vmatmul.msk.f32.gmra.mxu2 %vm96_vm1, %v56_v19  ;;  %v41_v18 = vld [vmem:[%s1559_s0 + $0x90] sm:$0xff] }
  0x26   :  { %931 = vmatmul.msk.f32.gmra.mxu3 %vm96_vm1, %v72_v20 }
  0x2b   :  { %886 = vmatmul.msk.f32.gmra.mxu0 %vm96_vm1, %v27_v21 }
  0x2c   :  { %906 = vmatmul.msk.f32.gmra.mxu1 %vm96_vm1, %v47_v22  ;;  %916 = vmatmul.msk.f32.gmra.mxu2 %vm96_vm1, %v57_v23 }
  0x2e   :  { %932 = vmatmul.msk.f32.gmra.mxu3 %vm96_vm1, %v73_v24 }
  0x33   :  { %887 = vmatmul.msk.f32.gmra.mxu0 %vm96_vm1, %v28_v25 }
  0x34   :  { %907 = vmatmul.msk.f32.gmra.mxu1 %vm96_vm1, %v48_v26  ;;  %917 = vmatmul.msk.f32.gmra.mxu2 %vm96_vm1, %v58_v27 }
  0x36   :  { %933 = vmatmul.msk.f32.gmra.mxu3 %vm96_vm1, %v74_v28 }
  0x3b   :  { %888 = vmatmul.msk.f32.gmra.mxu0 %vm96_vm1, %v29_v29 }
  0x3c   :  { %908 = vmatmul.msk.f32.gmra.mxu1 %vm96_vm1, %v49_v30  ;;  %918 = vmatmul.msk.f32.gmra.mxu2 %vm96_vm1, %v59_v31 }
  0x3e   :  { %934 = vmatmul.msk.f32.gmra.mxu3 %vm96_vm1, %v75_v32 }
  0x43   :  { %889 = vmatmul.msk.f32.gmra.mxu0 %vm96_vm1, %v30_v33  ;;  %v42_v33 = vld [vmem:[%s1559_s0 + $0x98] sm:$0xff] }
  0x44   :  { %909 = vmatmul.msk.f32.gmra.mxu1 %vm96_vm1, %v50_v34  ;;  %919 = vmatmul.msk.f32.gmra.mxu2 %vm96_vm1, %v60_v35 }
  0x46   :  { %935 = vmatmul.msk.f32.gmra.mxu3 %vm96_vm1, %v76_v36 }
  0x4b   :  { %890 = vmatmul.msk.f32.gmra.mxu0 %vm96_vm1, %v31_v37 }
  0x4c   :  { %910 = vmatmul.msk.f32.gmra.mxu1 %vm96_vm1, %v51_v38  ;;  %920 = vmatmul.msk.f32.gmra.mxu2 %vm96_vm1, %v61_v39 }
  0x4e   :  { %936 = vmatmul.msk.f32.gmra.mxu3 %vm96_vm1, %v77_v40 }
  0x53   :  { %891 = vmatmul.msk.f32.gmra.mxu0 %vm96_vm1, %v32_v41 }
  0x54   :  { %911 = vmatmul.msk.f32.gmra.mxu1 %vm96_vm1, %v52_v42  ;;  %921 = vmatmul.msk.f32.gmra.mxu2 %vm96_vm1, %v62_v43 }
  0x56   :  { %937 = vmatmul.msk.f32.gmra.mxu3 %vm96_vm1, %v78_v44 }
  0x5b   :  { %892 = vmatmul.msk.f32.gmra.mxu0 %vm96_vm1, %v33_v45 }
  0x5c   :  { %922 = vmatmul.msk.f32.gmra.mxu2 %vm96_vm1, %v63_v46 }
  0x5e   :  { %938 = vmatmul.msk.f32.gmra.mxu3 %vm96_vm1, %v79_v47 }
  0x63   :  { %893 = vmatmul.msk.f32.gmra.mxu0 %vm96_vm1, %v34_v48 }
  0x64   :  { %923 = vmatmul.msk.f32.gmra.mxu2 %vm96_vm1, %v64_v49 }
  0x66   :  { %939 = vmatmul.msk.f32.gmra.mxu3 %vm96_vm1, %v80_v50 }
  0x6b   :  { %894 = vmatmul.msk.f32.gmra.mxu0 %vm96_vm1, %v35_v51 }
  0x6c   :  { %924 = vmatmul.msk.f32.gmra.mxu2 %vm96_vm1, %v65_v52 }
  0x6e   :  { %940 = vmatmul.msk.f32.gmra.mxu3 %vm96_vm1, %v81_v53 }
  0x73   :  { %895 = vmatmul.msk.f32.gmra.mxu0 %vm96_vm1, %v36_v54 }
  0x74   :  { %925 = vmatmul.msk.f32.gmra.mxu2 %vm96_vm1, %v66_v55 }
  0x76   :  { %941 = vmatmul.msk.f32.gmra.mxu3 %vm96_vm1, %v82_v56 }
  0x7b   :  { %896 = vmatmul.msk.f32.gmra.mxu0 %vm96_vm1, %v37_v57 }
  0x7c   :  { %926 = vmatmul.msk.f32.gmra.mxu2 %vm96_vm1, %v67_v58 }
  0x7e   :  { %942 = vmatmul.msk.f32.gmra.mxu3 %vm96_vm1, %v83_v59 }
  0x83   :  { %897 = vmatmul.msk.f32.gmra.mxu0 %vm96_vm1, %v38_v60 }
  0x84   :  { %927 = vmatmul.msk.f32.gmra.mxu2 %vm96_vm1, %v68_v61 }
  0x86   :  { %943 = vmatmul.msk.f32.gmra.mxu3 %vm96_vm1, %v84_v62 }
  0x88   :  { %v1274_v63 = vpop.f32.mrf.mxu0 }
  0x89   :  { %v1279_v1 = vpop.f32.mrf.mxu1 }
  0x8b   :  { %898 = vmatmul.msk.f32.gmra.mxu0 %vm96_vm1, %v39_v0 }
  0x8e   :  { %944 = vmatmul.msk.f32.gmra.mxu3 %vm96_vm1, %v85_v2 }
  0x8f   :  { %v400_v4 = vpop.f32.mrf.mxu2 }
  0x90   :  { %v401_v5 = vadd.f32 %v1288_v3, %v400_v4  ;;  %v1292_v6 = vpop.f32.mrf.mxu0 }
  0x91   :  { %v1297_v8 = vpop.f32.mrf.mxu1  ;;  %v448_v9 = vpop.f32.mrf.mxu3 }
  0x92   :  { %v532_v11 = vmax.f32 %v401_v5, 0.0  ;;  %v449_v12 = vadd.f32 %v1288_v3, %v448_v9 }
  0x93   :  { %899 = vmatmul.msk.f32.gmra.mxu0 %vm96_vm1, %v40_v7 }
  0x94   :  { %v596_v14 = vmax.f32 %v532_v11, 1e-06  ;;  %v548_v16 = vmax.f32 %v449_v12, 0.0 }
  0x96   :  { %945 = vmatmul.msk.f32.gmra.mxu3 %vm96_vm1, %v86_v10  ;;  %v612_v24 = vmax.f32 %v548_v16, 1e-06  ;;  %v664_v26 = vmul.f32 %v596_v14, %v596_v14 }
  0x97   :  { %v403_v13 = vpop.f32.mrf.mxu2 }
  0x98   :  { %v404_v15 = vadd.f32 %v1288_v3, %v403_v13  ;;  %v1306_v17 = vpop.f32.mrf.mxu0  ;;  %v728_v32 = vmul.f32 %v664_v26, %v596_v14  ;;  %v680_v35 = vmul.f32 %v612_v24, %v612_v24 }
  0x99   :  { %v1311_v19 = vpop.f32.mrf.mxu1  ;;  %v451_v20 = vpop.f32.mrf.mxu3 }
  0x9a   :  { %v533_v21 = vmax.f32 %v404_v15, 0.0  ;;  %v452_v22 = vadd.f32 %v1288_v3, %v451_v20  ;;  %v744_v39 = vmul.f32 %v680_v35, %v612_v24 }
  0x9b   :  { %900 = vmatmul.msk.f32.gmra.mxu0 %vm96_vm1, %v41_v18 }
  0x9c   :  { %v597_v23 = vmax.f32 %v533_v21, 1e-06  ;;  %v549_v25 = vmax.f32 %v452_v22, 0.0  ;;  %v377_v21 = vadd.f32 %v1288_v3, %v1311_v19 }
  0x9e   :  { %v613_v27 = vmax.f32 %v549_v25, 1e-06  ;;  %v665_v28 = vmul.f32 %v597_v23, %v597_v23  ;;  %v524_v35 = vmax.f32 %v377_v21, 0.0 }
  0x9f   :  { %v1315_v29 = vpop.f32.mrf.mxu2 }
  0xa0   :  { %v1317_v30 = vpop.f32.mrf.mxu0  ;;  %v729_v31 = vmul.f32 %v665_v28, %v597_v23  ;;  %v681_v34 = vmul.f32 %v613_v27, %v613_v27 }
  0xa1   :  { %v379_v36 = vpop.f32.mrf.mxu1  ;;  %v1322_v37 = vpop.f32.mrf.mxu3 }
  0xa2   :  { %1565 = vst [vmem:[#allocation2_spill] sm:$0xff] %v1322_v37  ;;  %782 = vmatpush.msrb.mxu2 %v729_v31  ;;  %v745_v38 = vmul.f32 %v681_v34, %v613_v27  ;;  %v380_v15 = vadd.f32 %v1288_v3, %v379_v36  ;;  %v374_v34 = vadd.f32 %v1288_v3, %v1297_v8 }
  0xa3   :  { %901 = vmatmul.msk.f32.gmra.mxu0 %vm96_vm1, %v42_v33 }
  0xa4   :  { %783 = vmatpush.msrb.mxu2 %v728_v32  ;;  %802 = vmatpush.msrb.mxu3 %v745_v38  ;;  %v525_v27 = vmax.f32 %v380_v15, 0.0 }
  0xa6   :  { %803 = vmatpush.msrb.mxu3 %v744_v39 }
  0xa7   :  { %v1325_v40 = vpop.f32.mrf.mxu2 }
  0xa8   :  { %v1327_v41 = vpop.f32.mrf.mxu0 }
  0xa9   :  { %v382_v42 = vpop.f32.mrf.mxu1  ;;  %v1329_v43 = vpop.f32.mrf.mxu3 }
  0xaa   :  { %v383_v11 = vadd.f32 %v1288_v3, %v382_v42 }
  0xac   :  { %v526_v22 = vmax.f32 %v383_v11, 0.0 }
  0xae   :  { %v590_v38 = vmax.f32 %v526_v22, 1e-06 }
  0xaf   :  { %v1331_v44 = vpop.f32.mrf.mxu2 }
  0xb0   :  { %v1333_v45 = vpop.f32.mrf.mxu0 }
  0xb1   :  { %v385_v46 = vpop.f32.mrf.mxu1  ;;  %v1335_v47 = vpop.f32.mrf.mxu3 }
  0xb2   :  { %v386_v4 = vadd.f32 %v1288_v3, %v385_v46  ;;  %v371_v46 = vadd.f32 %v1288_v3, %v1279_v1 }
  0xb4   :  { %v527_v16 = vmax.f32 %v386_v4, 0.0  ;;  %v522_v4 = vmax.f32 %v371_v46, 0.0 }
  0xb6   :  { %v591_v28 = vmax.f32 %v527_v16, 1e-06  ;;  %v586_v15 = vmax.f32 %v522_v4, 1e-06 }
  0xb7   :  { %v1337_v48 = vpop.f32.mrf.mxu2 }
  0xb8   :  { %v1339_v49 = vpop.f32.mrf.mxu0 }
  0xb9   :  { %v388_v50 = vpop.f32.mrf.mxu1  ;;  %v1341_v51 = vpop.f32.mrf.mxu3 }
  0xba   :  { %v389_v62 = vadd.f32 %v1288_v3, %v388_v50  ;;  %v589_v50 = vmax.f32 %v525_v27, 1e-06 }
  0xbc   :  { %v528_v12 = vmax.f32 %v389_v62, 0.0  ;;  %v657_v11 = vmul.f32 %v589_v50, %v589_v50 }
  0xbe   :  { %v592_v23 = vmax.f32 %v528_v12, 1e-06  ;;  %v721_v16 = vmul.f32 %v657_v11, %v589_v50  ;;  %v320_v50 = vadd.f32 %v1288_v3, %v1317_v30 }
  0xbf   :  { %v1343_v52 = vpop.f32.mrf.mxu2 }
  0xc0   :  { %v1345_v53 = vpop.f32.mrf.mxu0  ;;  %v660_v42 = vmul.f32 %v592_v23, %v592_v23 }
  0xc1   :  { %v391_v54 = vpop.f32.mrf.mxu1  ;;  %v1347_v55 = vpop.f32.mrf.mxu3 }
  0xc2   :  { %v392_v61 = vadd.f32 %v1288_v3, %v391_v54  ;;  %v724_v62 = vmul.f32 %v660_v42, %v592_v23  ;;  %v654_v23 = vmul.f32 %v586_v15, %v586_v15 }
  0xc4   :  { %v529_v5 = vmax.f32 %v392_v61, 0.0  ;;  %v588_v61 = vmax.f32 %v524_v35, 1e-06  ;;  %v718_v27 = vmul.f32 %v654_v23, %v586_v15  ;;  %v1413_v23 = vadd.f32 %v1288_v3, %v1327_v41 }
  0xc6   :  { %v593_v18 = vmax.f32 %v529_v5, 1e-06 }
  0xc7   :  { %v1349_v56 = vpop.f32.mrf.mxu2 }
  0xc8   :  { %v1351_v57 = vpop.f32.mrf.mxu0  ;;  %v661_v33 = vmul.f32 %v593_v18, %v593_v18 }
  0xc9   :  { %v394_v58 = vpop.f32.mrf.mxu1  ;;  %v1353_v59 = vpop.f32.mrf.mxu3 }
  0xca   :  { %v395_v60 = vadd.f32 %v1288_v3, %v394_v58  ;;  %v725_v54 = vmul.f32 %v661_v33, %v593_v18  ;;  %v659_v58 = vmul.f32 %v591_v28, %v591_v28 }
  0xcc   :  { %v530_v0 = vmax.f32 %v395_v60, 0.0  ;;  %v523_v60 = vmax.f32 %v374_v34, 0.0  ;;  %v317_v34 = vadd.f32 %v1288_v3, %v1306_v17 }
  0xce   :  { %v594_v13 = vmax.f32 %v530_v0, 1e-06  ;;  %v658_v0 = vmul.f32 %v590_v38, %v590_v38  ;;  %v504_v46 = vmax.f32 %v317_v34, 0.0 }
  0xcf   :  { %v1358_v2 = vpop.f32.mrf.mxu2 }
  0xd0   :  { %v1361_v7 = vpop.f32.mrf.mxu0  ;;  %v662_v25 = vmul.f32 %v594_v13, %v594_v13  ;;  %v722_v1 = vmul.f32 %v658_v0, %v590_v38 }
  0xd1   :  { %v397_v9 = vpop.f32.mrf.mxu1  ;;  %v1363_v10 = vpop.f32.mrf.mxu3 }
  0xd2   :  { %v398_v14 = vadd.f32 %v1288_v3, %v397_v9  ;;  %v726_v39 = vmul.f32 %v662_v25, %v594_v13  ;;  %v723_v9 = vmul.f32 %v659_v58, %v591_v28  ;;  %v587_v13 = vmax.f32 %v523_v60, 1e-06 }
  0xd3   :  { %v311_v28 = vadd.f32 %v1288_v3, %v1274_v63  ;;  %v568_v60 = vmax.f32 %v504_v46, 1e-06 }
  0xd4   :  { %v531_v20 = vmax.f32 %v398_v14, 0.0  ;;  %v656_v14 = vmul.f32 %v588_v61, %v588_v61 }
  0xd5   :  { %v636_v11 = vmul.f32 %v568_v60, %v568_v60 }
  0xd6   :  { %v595_v24 = vmax.f32 %v531_v20, 1e-06  ;;  %v720_v18 = vmul.f32 %v656_v14, %v588_v61  ;;  %v655_v20 = vmul.f32 %v587_v13, %v587_v13 }
  0xd7   :  { %v1370_v26 = vpop.f32.mrf.mxu2 }
  0xd8   :  { %v1372_v31 = vpop.f32.mrf.mxu0  ;;  %v663_v32 = vmul.f32 %v595_v24, %v595_v24  ;;  %v719_v25 = vmul.f32 %v655_v20, %v587_v13 }
  0xd9   :  { %v1376_v36 = vpop.f32.mrf.mxu3  ;;  %v341_v46 = vadd.f32 %v1288_v3, %v1372_v31  ;;  %v335_v31 = vadd.f32 %v1288_v3, %v1351_v57 }
  0xda   :  { %v727_v19 = vmul.f32 %v663_v32, %v595_v24  ;;  %v314_v32 = vadd.f32 %v1288_v3, %v1292_v6 }
  0xdc   :  { %784 = vmatpush.msrb.mxu2 %v727_v19  ;;  %v407_v19 = vadd.f32 %v1288_v3, %v1315_v29  ;;  %v503_v42 = vmax.f32 %v314_v32, 0.0  ;;  %v1420_v32 = vmul.f32 %v636_v11, %v568_v60  ;;  %v512_v11 = vmax.f32 %v341_v46, 0.0 }
  0xde   :  { %785 = vmatpush.msrb.mxu2 %v726_v39  ;;  %v502_v39 = vmax.f32 %v311_v28, 0.0  ;;  %v534_v63 = vmax.f32 %v407_v19, 0.0  ;;  %v567_v58 = vmax.f32 %v503_v42, 1e-06 }
  0xdf   :  { %v1380_v8 = vpop.f32.mrf.mxu2 }
  0xe0   :  { %786 = vmatpush.msrb.mxu2 %v725_v54  ;;  %v343_v5 = vpop.f32.mrf.mxu0  ;;  %v566_v54 = vmax.f32 %v502_v39, 1e-06  ;;  %v598_v0 = vmax.f32 %v534_v63, 1e-06  ;;  %v1436_v39 = vadd.f32 %v1288_v3, %v1339_v49  ;;  %v338_v49 = vadd.f32 %v1288_v3, %v1361_v7 }
  0xe1   :  { %v1382_v12 = vpop.f32.mrf.mxu3 }
  0xe2   :  { %787 = vmatpush.msrb.mxu2 %v724_v62  ;;  %v505_v62 = vmax.f32 %v320_v50, 0.0  ;;  %v634_v29 = vmul.f32 %v566_v54, %v566_v54  ;;  %v666_v30 = vmul.f32 %v598_v0, %v598_v0 }
  0xe4   :  { %788 = vmatpush.msrb.mxu2 %v723_v9  ;;  %v635_v9 = vmul.f32 %v567_v58, %v567_v58  ;;  %v1403_v13 = vmax.f32 %v505_v62, 1e-06  ;;  %v1409_v20 = vmul.f32 %v634_v29, %v566_v54 }
  0xe6   :  { %789 = vmatpush.msrb.mxu2 %v722_v1  ;;  %v1428_v41 = vmul.f32 %v1403_v13, %v1403_v13 }
  0xe7   :  { %v1384_v21 = vpop.f32.mrf.mxu2 }
  0xe8   :  { %790 = vmatpush.msrb.mxu2 %v721_v16  ;;  %v346_v22 = vpop.f32.mrf.mxu0  ;;  %v434_v7 = vadd.f32 %v1288_v3, %v1384_v21 }
  0xe9   :  { %v1386_v24 = vpop.f32.mrf.mxu3  ;;  %v347_v14 = vadd.f32 %v1288_v3, %v346_v22  ;;  %v344_v22 = vadd.f32 %v1288_v3, %v343_v5  ;;  %v1439_v5 = vmul.f32 %v666_v30, %v598_v0 }
  0xea   :  { %791 = vmatpush.msrb.mxu2 %v720_v18  ;;  %v1407_v18 = vmul.f32 %v635_v9, %v567_v58  ;;  %v576_v58 = vmax.f32 %v512_v11, 1e-06 }
  0xeb   :  { %v514_v50 = vmax.f32 %v347_v14, 0.0 }
  0xec   :  { %792 = vmatpush.msrb.mxu2 %v719_v25  ;;  %v1417_v25 = vadd.f32 %v1288_v3, %v1333_v45  ;;  %v1432_v45 = vadd.f32 %v1288_v3, %v1325_v40  ;;  %v332_v40 = vadd.f32 %v1288_v3, %v1345_v53 }
  0xee   :  { %793 = vmatpush.msrb.mxu2 %v718_v27 }
  0xef   :  { %v436_v33 = vpop.f32.mrf.mxu2 }
  0xf0   :  { %v349_v35 = vpop.f32.mrf.mxu0  ;;  %v437_v9 = vadd.f32 %v1288_v3, %v436_v33 }
  0xf1   :  { %v1394_v38 = vpop.f32.mrf.mxu3  ;;  %v350_v1 = vadd.f32 %v1288_v3, %v349_v35 }
  0xf2   :  { %v544_v46 = vmax.f32 %v437_v9, 0.0 }
  0xf3   :  { %v515_v34 = vmax.f32 %v350_v1, 0.0  ;;  %v578_v1 = vmax.f32 %v514_v50, 1e-06 }
  0xf5   :  { %v579_v62 = vmax.f32 %v515_v34, 1e-06 }
  0xf7   :  { %v439_v6 = vpop.f32.mrf.mxu2  ;;  %v647_v33 = vmul.f32 %v579_v62, %v579_v62 }
  0xf8   :  { %v352_v61 = vpop.f32.mrf.mxu0  ;;  %v440_v42 = vadd.f32 %v1288_v3, %v439_v6  ;;  %v513_v6 = vmax.f32 %v344_v22, 0.0  ;;  %v511_v22 = vmax.f32 %v338_v49, 0.0  ;;  %v543_v49 = vmax.f32 %v434_v7, 0.0 }
  0xf9   :  { %v1400_v17 = vpop.f32.mrf.mxu3  ;;  %v353_v4 = vadd.f32 %v1288_v3, %v352_v61  ;;  %v644_v7 = vmul.f32 %v576_v58, %v576_v58 }
  0xfa   :  { %v545_v29 = vmax.f32 %v440_v42, 0.0  ;;  %v577_v34 = vmax.f32 %v513_v6, 1e-06  ;;  %v431_v42 = vadd.f32 %v1288_v3, %v1380_v8  ;;  %v575_v60 = vmax.f32 %v511_v22, 1e-06 }
  0xfb   :  { %v516_v15 = vmax.f32 %v353_v4, 0.0  ;;  %v711_v8 = vmul.f32 %v647_v33, %v579_v62  ;;  %v419_v62 = vadd.f32 %v1288_v3, %v1343_v52  ;;  %v413_v52 = vadd.f32 %v1288_v3, %v1331_v44 }
  0xfc   :  { %v609_v50 = vmax.f32 %v545_v29, 1e-06  ;;  %v645_v9 = vmul.f32 %v577_v34, %v577_v34  ;;  %v542_v29 = vmax.f32 %v431_v42, 0.0  ;;  %v1568_v44 = vmax.f32 %v1413_v23, 0.0 }
  0xfd   :  { %v580_v63 = vmax.f32 %v516_v15, 1e-06  ;;  %v509_v15 = vmax.f32 %v332_v40, 0.0  ;;  %v510_v40 = vmax.f32 %v335_v31, 0.0 }
  0xfe   :  { %v677_v11 = vmul.f32 %v609_v50, %v609_v50  ;;  %v709_v33 = vmul.f32 %v645_v9, %v577_v34 }
  0xff   :  { %v442_v16 = vpop.f32.mrf.mxu2  ;;  %v648_v53 = vmul.f32 %v580_v63, %v580_v63  ;;  %v573_v22 = vmax.f32 %v509_v15, 1e-06 }
 0x100   :  { %v443_v27 = vadd.f32 %v1288_v3, %v442_v16  ;;  %v355_v28 = vpop.f32.mrf.mxu0 }
 0x101   :  { %v356_v35 = vadd.f32 %v1288_v3, %v355_v28  ;;  %v1424_v19 = vpop.f32.mrf.mxu3  ;;  %v712_v21 = vmul.f32 %v648_v53, %v580_v63  ;;  %v422_v63 = vadd.f32 %v1288_v3, %v1349_v56  ;;  %v574_v53 = vmax.f32 %v510_v40, 1e-06 }
 0x102   :  { %v546_v61 = vmax.f32 %v443_v27, 0.0  ;;  %v606_v56 = vmax.f32 %v542_v29, 1e-06  ;;  %v741_v40 = vmul.f32 %v677_v11, %v609_v50 }
 0x103   :  { %v517_v54 = vmax.f32 %v356_v35, 0.0  ;;  %v539_v15 = vmax.f32 %v422_v63, 0.0  ;;  %v536_v63 = vmax.f32 %v413_v52, 0.0 }
 0x104   :  { %v610_v16 = vmax.f32 %v546_v61, 1e-06  ;;  %v646_v61 = vmul.f32 %v578_v1, %v578_v1  ;;  %v674_v29 = vmul.f32 %v606_v56, %v606_v56 }
 0x105   :  { %v581_v0 = vmax.f32 %v517_v54, 1e-06  ;;  %v600_v52 = vmax.f32 %v536_v63, 1e-06 }
 0x107   :  { %v445_v30 = vpop.f32.mrf.mxu2  ;;  %v649_v14 = vmul.f32 %v581_v0, %v581_v0 }
 0x108   :  { %v446_v27 = vadd.f32 %v1288_v3, %v445_v30  ;;  %v1456_v28 = vpop.f32.mrf.mxu0  ;;  %v428_v30 = vadd.f32 %v1288_v3, %v1370_v26  ;;  %v710_v26 = vmul.f32 %v646_v61, %v578_v1  ;;  %v416_v61 = vadd.f32 %v1288_v3, %v1337_v48 }
 0x109   :  { %v713_v57 = vmul.f32 %v649_v14, %v581_v0  ;;  %v1458_v35 = vpop.f32.mrf.mxu3  ;;  %v678_v0 = vmul.f32 %v610_v16, %v610_v16  ;;  %v425_v14 = vadd.f32 %v1288_v3, %v1358_v2  ;;  %v641_v48 = vmul.f32 %v573_v22, %v573_v22 }
 0x10a   :  { %v547_v54 = vmax.f32 %v446_v27, 0.0  ;;  %v608_v27 = vmax.f32 %v544_v46, 1e-06  ;;  %v643_v46 = vmul.f32 %v575_v60, %v575_v60 }
 0x10b   :  { %762 = vmatpush.msrb.mxu1 %v713_v57  ;;  %v541_v57 = vmax.f32 %v428_v30, 0.0  ;;  %v742_v37 = vmul.f32 %v678_v0, %v610_v16  ;;  %v1566_v16 = vmax.f32 %v1436_v39, 0.0 }
 0x10c   :  { %v611_v6 = vmax.f32 %v547_v54, 1e-06  ;;  %v607_v54 = vmax.f32 %v543_v49, 1e-06  ;;  %v676_v1 = vmul.f32 %v608_v27, %v608_v27  ;;  %v708_v49 = vmul.f32 %v644_v7, %v576_v58 }
 0x10d   :  { %763 = vmatpush.msrb.mxu1 %v712_v21  ;;  %v540_v21 = vmax.f32 %v425_v14, 0.0  ;;  %v572_v30 = vmax.f32 %v1566_v16, 1e-06  ;;  %v605_v34 = vmax.f32 %v541_v57, 1e-06  ;;  %v538_v14 = vmax.f32 %v419_v62, 0.0 }
 0x10e   :  { %v679_v31 = vmul.f32 %v611_v6, %v611_v6  ;;  %v675_v0 = vmul.f32 %v607_v54, %v607_v54  ;;  %v740_v39 = vmul.f32 %v676_v1, %v608_v27  ;;  %v1482_v58 = vmul.f32 %v1428_v41, %v1403_v13 }
 0x10f   :  { %764 = vmatpush.msrb.mxu1 %v711_v8  ;;  %v707_v8 = vmul.f32 %v643_v46, %v575_v60  ;;  %v604_v9 = vmax.f32 %v540_v21, 1e-06  ;;  %v673_v7 = vmul.f32 %v605_v34, %v605_v34  ;;  %v602_v62 = vmax.f32 %v538_v14, 1e-06 }
 0x110   :  { %v743_v4 = vmul.f32 %v679_v31, %v611_v6  ;;  %v1468_v2 = vpop.f32.mrf.mxu0  ;;  %v642_v6 = vmul.f32 %v574_v53, %v574_v53  ;;  %v570_v31 = vmax.f32 %v1568_v44, 1e-06  ;;  %v739_v60 = vmul.f32 %v675_v0, %v607_v54 }
 0x111   :  { %765 = vmatpush.msrb.mxu1 %v710_v26  ;;  %v496_v42 = vpop.f32.mrf.mxu3  ;;  %v603_v26 = vmax.f32 %v539_v15, 1e-06  ;;  %v705_v27 = vmul.f32 %v641_v48, %v573_v22  ;;  %v738_v41 = vmul.f32 %v674_v29, %v606_v56  ;;  %v672_v21 = vmul.f32 %v604_v9, %v604_v9 }
 0x112   :  { %804 = vmatpush.msrb.mxu3 %v743_v4  ;;  %v1567_v4 = vmax.f32 %v1417_v25, 0.0  ;;  %v706_v11 = vmul.f32 %v642_v6, %v574_v53  ;;  %v640_v25 = vmul.f32 %v572_v30, %v572_v30  ;;  %v497_v23 = vadd.f32 %v1288_v3, %v496_v42 }
 0x113   :  { %766 = vmatpush.msrb.mxu1 %v709_v33  ;;  %v494_v22 = vadd.f32 %v1288_v3, %v1458_v35  ;;  %v737_v16 = vmul.f32 %v673_v7, %v605_v34  ;;  %v671_v6 = vmul.f32 %v603_v26, %v603_v26  ;;  %v362_v56 = vadd.f32 %v1288_v3, %v1468_v2 }
 0x114   :  { %805 = vmatpush.msrb.mxu3 %v742_v37  ;;  %v571_v50 = vmax.f32 %v1567_v4, 1e-06  ;;  %v537_v37 = vmax.f32 %v416_v61, 0.0  ;;  %v704_v54 = vmul.f32 %v640_v25, %v572_v30  ;;  %v638_v61 = vmul.f32 %v570_v31, %v570_v31 }
 0x115   :  { %767 = vmatpush.msrb.mxu1 %v708_v49  ;;  %v564_v0 = vmax.f32 %v497_v23, 0.0  ;;  %v736_v30 = vmul.f32 %v672_v21, %v604_v9  ;;  %v670_v4 = vmul.f32 %v602_v62, %v602_v62  ;;  %v563_v48 = vmax.f32 %v494_v22, 0.0 }
 0x116   :  { %806 = vmatpush.msrb.mxu3 %v741_v40  ;;  %v639_v46 = vmul.f32 %v571_v50, %v571_v50  ;;  %v535_v40 = vmax.f32 %v1432_v45, 0.0  ;;  %v601_v1 = vmax.f32 %v537_v37, 1e-06  ;;  %v491_v45 = vadd.f32 %v1288_v3, %v1424_v19 }
 0x117   :  { %768 = vmatpush.msrb.mxu1 %v707_v8  ;;  %v702_v35 = vmul.f32 %v638_v61, %v570_v31  ;;  %v359_v8 = vadd.f32 %v1288_v3, %v1456_v28  ;;  %v668_v19 = vmul.f32 %v600_v52, %v600_v52  ;;  %v519_v44 = vmax.f32 %v362_v56, 0.0 }
 0x118   :  { %807 = vmatpush.msrb.mxu3 %v740_v39  ;;  %v364_v57 = vpop.f32.mrf.mxu0  ;;  %v703_v42 = vmul.f32 %v639_v46, %v571_v50  ;;  %v599_v14 = vmax.f32 %v535_v40, 1e-06  ;;  %v669_v34 = vmul.f32 %v601_v1, %v601_v1  ;;  %v488_v50 = vadd.f32 %v1288_v3, %v1400_v17 }
 0x119   :  { %769 = vmatpush.msrb.mxu1 %v706_v11  ;;  %v499_v33 = vpop.f32.mrf.mxu3  ;;  %v365_v13 = vadd.f32 %v1288_v3, %v364_v57  ;;  %v735_v39 = vmul.f32 %v671_v6, %v603_v26  ;;  %v485_v31 = vadd.f32 %v1288_v3, %v1394_v38  ;;  %v562_v11 = vmax.f32 %v491_v45, 0.0 }
 0x11a   :  { %808 = vmatpush.msrb.mxu3 %v739_v60  ;;  %v500_v53 = vadd.f32 %v1288_v3, %v499_v33  ;;  %v628_v25 = vmax.f32 %v564_v0, 1e-06  ;;  %v734_v28 = vmul.f32 %v670_v4, %v602_v62  ;;  %v733_v17 = vmul.f32 %v669_v34, %v601_v1 }
 0x11b   :  { %770 = vmatpush.msrb.mxu1 %v705_v27  ;;  %v520_v15 = vmax.f32 %v365_v13, 0.0  ;;  %v667_v63 = vmul.f32 %v599_v14, %v599_v14  ;;  %v518_v60 = vmax.f32 %v359_v8, 0.0  ;;  %v482_v7 = vadd.f32 %v1288_v3, %v1386_v24 }
 0x11c   :  { %809 = vmatpush.msrb.mxu3 %v738_v41  ;;  %v565_v49 = vmax.f32 %v500_v53, 0.0  ;;  %v561_v57 = vmax.f32 %v488_v50, 0.0  ;;  %v627_v27 = vmax.f32 %v563_v48, 1e-06  ;;  %v732_v38 = vmul.f32 %v668_v19, %v600_v52 }
 0x11d   :  { %771 = vmatpush.msrb.mxu1 %v704_v54  ;;  %v584_v9 = vmax.f32 %v520_v15, 1e-06  ;;  %v583_v46 = vmax.f32 %v519_v44, 1e-06  ;;  %v560_v62 = vmax.f32 %v485_v31, 0.0  ;;  %v696_v53 = vmul.f32 %v628_v25, %v628_v25  ;;  %v632_v15 = vld [vmem:[%s1561_s3 + $0x10] sm:$0xff] }
 0x11e   :  { %810 = vmatpush.msrb.mxu3 %v737_v16  ;;  %v629_v2 = vmax.f32 %v565_v49, 1e-06  ;;  %v626_v41 = vmax.f32 %v562_v11, 1e-06  ;;  %v476_v24 = vadd.f32 %v1288_v3, %v1376_v36  ;;  %v731_v21 = vmul.f32 %v667_v63, %v599_v14 }
 0x11f   :  { %772 = vmatpush.msrb.mxu1 %v703_v42  ;;  %v652_v23 = vmul.f32 %v584_v9, %v584_v9  ;;  %v582_v40 = vmax.f32 %v518_v60, 1e-06  ;;  %v625_v54 = vmax.f32 %v561_v57, 1e-06  ;;  %v695_v61 = vmul.f32 %v627_v27, %v627_v27  ;;  %v1569_v60 = vld [vmem:[#allocation2_spill] sm:$0xff] }
 0x120   :  { %811 = vmatpush.msrb.mxu3 %v736_v30  ;;  %v367_v29 = vpop.f32.mrf.mxu0  ;;  %v697_v33 = vmul.f32 %v629_v2, %v629_v2  ;;  %v473_v16 = vadd.f32 %v1288_v3, %v1363_v10  ;;  %v624_v52 = vmax.f32 %v560_v62, 1e-06  ;;  %v694_v42 = vmul.f32 %v626_v41, %v626_v41 }
 0x121   :  { %773 = vmatpush.msrb.mxu1 %v702_v35  ;;  %v368_v37 = vadd.f32 %v1288_v3, %v367_v29  ;;  %v716_v49 = vmul.f32 %v652_v23, %v584_v9  ;;  %v760_v56 = vmul.f32 %v696_v53, %v628_v25  ;;  %v470_v45 = vadd.f32 %v1288_v3, %v1353_v59 }
 0x122   :  { %812 = vmatpush.msrb.mxu3 %v735_v39  ;;  %v761_v22 = vmul.f32 %v697_v33, %v629_v2  ;;  %v650_v10 = vmul.f32 %v582_v40, %v582_v40  ;;  %v693_v30 = vmul.f32 %v625_v54, %v625_v54  ;;  %v759_v4 = vmul.f32 %v695_v61, %v627_v27 }
 0x123   :  { %774 = vmatpush.msrb.mxu1 %v1482_v58  ;;  %v521_v26 = vmax.f32 %v368_v37, 0.0  ;;  %v479_v58 = vadd.f32 %v1288_v3, %v1382_v12  ;;  %v630_v12 = vld [vmem:[%s1561_s3] sm:$0xff]  ;;  %v467_v14 = vadd.f32 %v1288_v3, %v1347_v55  ;;  %v556_v34 = vmax.f32 %v473_v16, 0.0  ;;  %v633_v16 = vld [vmem:[%s1561_s3 + $0x18] sm:$0xff] }
 0x124   :  { %813 = vmatpush.msrb.mxu3 %v734_v28  ;;  %v692_v50 = vmul.f32 %v624_v52, %v624_v52  ;;  %v758_v59 = vmul.f32 %v694_v42, %v626_v41  ;;  %v464_v48 = vadd.f32 %v1288_v3, %v1341_v51  ;;  %v714_v2 = vmul.f32 %v650_v10, %v582_v40 }
 0x125   :  { %775 = vmatpush.msrb.mxu1 %v1420_v32  ;;  %v585_v13 = vmax.f32 %v521_v26, 1e-06  ;;  %v559_v32 = vmax.f32 %v482_v7, 0.0  ;;  %v558_v6 = vmax.f32 %v479_v58, 0.0  ;;  %v555_v39 = vmax.f32 %v470_v45, 0.0 }
 0x126   :  { %814 = vmatpush.msrb.mxu3 %v733_v17  ;;  %v757_v19 = vmul.f32 %v693_v30, %v625_v54  ;;  %v461_v44 = vadd.f32 %v1288_v3, %v1335_v47  ;;  %v554_v9 = vmax.f32 %v467_v14, 0.0  ;;  %v620_v37 = vmax.f32 %v556_v34, 1e-06 }
 0x127   :  { %776 = vmatpush.msrb.mxu1 %v1407_v18  ;;  %v653_v1 = vmul.f32 %v585_v13, %v585_v13  ;;  %v651_v18 = vmul.f32 %v583_v46, %v583_v46  ;;  %v623_v0 = vmax.f32 %v559_v32, 1e-06  ;;  %v622_v8 = vmax.f32 %v558_v6, 1e-06  ;;  %v844_v6 = vld [vmem:[%s1563_s4] sm:$0xff] }
 0x128   :  { %815 = vmatpush.msrb.mxu3 %v732_v38  ;;  %v756_v11 = vmul.f32 %v692_v50, %v624_v52  ;;  %v458_v51 = vadd.f32 %v1288_v3, %v1329_v43  ;;  %v553_v25 = vmax.f32 %v464_v48, 0.0  ;;  %v619_v28 = vmax.f32 %v555_v39, 1e-06 }
 0x129   :  { %777 = vmatpush.msrb.mxu1 %v1409_v20  ;;  %v717_v36 = vmul.f32 %v653_v1, %v585_v13  ;;  %v557_v20 = vmax.f32 %v476_v24, 0.0  ;;  %v715_v35 = vmul.f32 %v651_v18, %v583_v46  ;;  %v691_v55 = vmul.f32 %v623_v0, %v623_v0  ;;  %v845_v18 = vld [vmem:[%s1563_s4 + $0x8] sm:$0xff] }
 0x12a   :  { %816 = vmatpush.msrb.mxu3 %v731_v21  ;;  %778 = vmatmul.f32.vlgmr.msrb.gmra.mxu1 %v630_v12  ;;  %v690_v31 = vmul.f32 %v622_v8, %v622_v8  ;;  %v455_v26 = vadd.f32 %v1288_v3, %v1569_v60  ;;  %v552_v7 = vmax.f32 %v461_v44, 0.0  ;;  %v618_v47 = vmax.f32 %v554_v9, 1e-06 }
 0x12b   :  { %822 = vmatpush.msra.mxu1 %v761_v22  ;;  %794 = vmatpush.msrb.mxu2 %v717_v36  ;;  %v621_v29 = vmax.f32 %v557_v20, 1e-06  ;;  %v755_v63 = vmul.f32 %v691_v55, %v623_v0  ;;  %v688_v57 = vmul.f32 %v620_v37, %v620_v37  ;;  %v551_v33 = vmax.f32 %v458_v51, 0.0  ;;  %v847_v36 = vld [vmem:[%s1563_s4 + $0x18] sm:$0xff] }
 0x12c   :  { %817 = vmatpush.msrb.mxu3 %v1439_v5  ;;  %v631_v5 = vld [vmem:[%s1561_s3 + $0x8] sm:$0xff]  ;;  %v754_v27 = vmul.f32 %v690_v31, %v622_v8  ;;  %v617_v38 = vmax.f32 %v553_v25, 1e-06  ;;  %v687_v46 = vmul.f32 %v619_v28, %v619_v28  ;;  %v550_v23 = vmax.f32 %v455_v26, 0.0  ;;  %v987_v31 = vld [vmem:[%s1562_s5] ss:$0 sm:$0xff] }
 0x12d   :  { %823 = vmatpush.msra.mxu1 %v760_v56  ;;  %795 = vmatpush.msrb.mxu2 %v716_v49  ;;  %v689_v17 = vmul.f32 %v621_v29, %v621_v29  ;;  %v616_v43 = vmax.f32 %v552_v7, 1e-06  ;;  %v686_v58 = vmul.f32 %v618_v47, %v618_v47  ;;  %v752_v62 = vmul.f32 %v688_v57, %v620_v37  ;;  %v846_v49 = vld [vmem:[%s1563_s4 + $0x10] sm:$0xff] }
 0x12e   :  { %818 = vmatmul.f32.vlgmr.msrb.gmra.mxu3 %v632_v15  ;;  %v615_v41 = vmax.f32 %v551_v33, 1e-06  ;;  %v685_v53 = vmul.f32 %v617_v38, %v617_v38  ;;  %v751_v24 = vmul.f32 %v687_v46, %v619_v28  ;;  %v614_v3 = vmax.f32 %v550_v23, 1e-06 }
 0x12f   :  { %824 = vmatpush.msra.mxu1 %v759_v4  ;;  %796 = vmatpush.msrb.mxu2 %v715_v35  ;;  %v753_v13 = vmul.f32 %v689_v17, %v621_v29  ;;  %v684_v21 = vmul.f32 %v616_v43, %v616_v43  ;;  %v750_v40 = vmul.f32 %v686_v58, %v618_v47 }
 0x130   :  { %v683_v1 = vmul.f32 %v615_v41, %v615_v41  ;;  %v749_v32 = vmul.f32 %v685_v53, %v617_v38  ;;  %v682_v54 = vmul.f32 %v614_v3, %v614_v3 }
 0x131   :  { %825 = vmatpush.msra.mxu1 %v758_v59  ;;  %797 = vmatpush.msrb.mxu2 %v714_v2  ;;  %v748_v61 = vmul.f32 %v684_v21, %v616_v43 }
 0x132   :  { %798 = vmatmul.f32.vlgmr.msrb.gmra.mxu2 %v631_v5  ;;  %v747_v22 = vmul.f32 %v683_v1, %v615_v41  ;;  %v746_v12 = vmul.f32 %v682_v54, %v614_v3 }
 0x133   :  { %826 = vmatpush.msra.mxu1 %v757_v19  ;;  %868 = vmatpush.msra.mxu2 %v847_v36 }
 0x135   :  { %827 = vmatpush.msra.mxu1 %v756_v11  ;;  %869 = vmatpush.msra.mxu2 %v846_v49 }
 0x137   :  { %828 = vmatpush.msra.mxu1 %v755_v63  ;;  %870 = vmatpush.msra.mxu2 %v845_v18 }
 0x139   :  { %829 = vmatpush.msra.mxu1 %v754_v27  ;;  %871 = vmatpush.msra.mxu2 %v844_v6 }
 0x13b   :  { %830 = vmatpush.msra.mxu1 %v753_v13 }
 0x13d   :  { %831 = vmatpush.msra.mxu1 %v752_v62 }
 0x13f   :  { %832 = vmatpush.msra.mxu1 %v751_v24 }
 0x141   :  { %833 = vmatpush.msra.mxu1 %v750_v40 }
 0x143   :  { %834 = vmatpush.msra.mxu1 %v749_v32 }
 0x145   :  { %835 = vmatpush.msra.mxu1 %v748_v61 }
 0x147   :  { %836 = vmatpush.msra.mxu1 %v747_v22 }
 0x149   :  { %837 = vmatpush.msra.mxu1 %v746_v12 }
 0x14a   :  { %838 = vmatmul.f32.vlgmr.msra.gmra.mxu1 %v633_v16 }
 0x1a7   :  { %v779_v52 = vpop.f32.mrf.mxu1 }
 0x1b1   :  { %v819_v15 = vpop.f32.mrf.mxu3 }
 0x1b5   :  { %v799_v42 = vpop.f32.mrf.mxu2 }
 0x1b6   :  { %v800_v56 = vadd.f32 %v799_v42, %v779_v52 }
 0x1b8   :  { %v820_v45 = vadd.f32 %v819_v15, %v800_v56 }
 0x1c7   :  { %v839_v10 = vpop.f32.mrf.mxu1 }
 0x1c8   :  { %v840_v20 = vadd.f32 %v839_v10, %v820_v45 }
 0x1ca   :  { %v842_v0 = vmax.f32 %v840_v20, 1e-18 }
 0x1cc   :  { %v964_v30 = vand.u32 2147483647, %v842_v0  ;;  %v981_v29 = vand.u32 2147483648, %v842_v0  ;;  %vm963_vm4 = vcmp.lt.f32.partialorder %v842_v0, 0.0  ;;  %vm962_vm5 = vcmp.eq.f32.partialorder %v842_v0, 0.0 }
 0x1ce   :  { %988 = vlog2.f32 %v964_v30  ;;  %vm978_vm2 = vweird.f32 %v964_v30  ;;  %vm980_vm3 = vcmp.eq.f32.partialorder %v964_v30, 0.0  ;;  %vm965_vm7 = vcmp.eq.f32.partialorder %v964_v30, inf }
 0x1d4   :  { %v989_v4 = vpop.eup %988 }
 0x1d5   :  { %v968_v14 = vmul.f32 -0.33333334, %v989_v4 }
 0x1d7   :  { %990 = vpow2.f32 %v968_v14 }
 0x1dd   :  { %v991_v35 = vpop.eup %990 }
 0x1de   :  { %v970_v34 = vmul.f32 %v991_v35, %v991_v35 }
 0x1e0   :  { %v971_v8 = vmul.f32 %v970_v34, %v964_v30 }
 0x1e2   :  { %v972_v50 = vmul.f32 %v971_v8, %v970_v34 }
 0x1e4   :  { %v973_v59 = vsub.f32 %v972_v50, %v991_v35 }
 0x1e6   :  { %v974_v48 = vmul.f32 -0.33333334, %v973_v59 }
 0x1e8   :  { %v975_v2 = vadd.f32 %v991_v35, %v974_v48 }
 0x1ea   :  { %v976_v5 = vmul.f32 %v975_v2, %v842_v0 }
 0x1ec   :  { %v977_v39 = vmul.f32 %v976_v5, %v975_v2 }
 0x1ee   :  { %v979_v55 = vsel %vm978_vm2, %v842_v0, %v977_v39 }
 0x1ef   :  { %v982_v19 = vsel %vm980_vm3, %v981_v29, %v979_v55 }
 0x1f0   :  { %v983_v44 = vsel %vm963_vm4, nan, %v982_v19 }
 0x1f1   :  { %v984_v9 = vsel %vm962_vm5, 0.0, %v983_v44 }
 0x1f2   :  { %v985_v37 = vsel %vm965_vm7, inf, %v984_v9 }
 0x1f3   :  { %946 = vmatmul.msk.f32.vlgmr.msra.gmra.mxu2 %vm852_vm6, %v985_v37 }
 0x276   :  { %v873_v11 = vpop.f32.mrf.mxu2 }
 0x277   :  { %v874_v51 = vadd.f32 %v987_v31, %v873_v11 }
 0x279   :  { %876 = vst [vmem:[%s1564_s6] sm:$0xff] %v874_v51 }

</bundles_post_ra>
